<compile_context>
chip_gen: v7x
topology: tpu7x:2x2x1
jax: 0.10.0
libtpu: 0.0.40
codegen_flags: <defaults>
</compile_context>

<pallas_src>
import jax
import jax.numpy as jnp
from jax.experimental import pallas as pl
from jax.experimental.pallas import tpu as pltpu


def _conv_bn_kernel(w_ref, p_ref, s_ref, b_ref, o_ref):
    # MXU matmul over the (small) K = C_in*9 contraction with f32 accumulation,
    # then fused BatchNorm affine epilogue (per-output-channel scale/shift).
    acc = jnp.dot(w_ref[...], p_ref[...], preferred_element_type=jnp.float32)
    o_ref[...] = (acc * s_ref[...] + b_ref[...]).astype(o_ref.dtype)


def stem_forward(x, weight, gamma=None, beta=None,
                 running_mean=None, running_var=None,
                 eps=1e-5, use_bn=True, tile_m=256):
    """Conv2d(C_in -> C_out, k=3, pad=1, bias=False) [+ BatchNorm2d], NCHW."""
    N, C_in, H, W = x.shape
    C_out, C_in_w, KH, KW = weight.shape
    assert (C_in_w, KH, KW) == (C_in, 3, 3)

    f32 = jnp.float32
    out_dtype = x.dtype

    # ---- glue: im2col (pad=1, stride=1) -> patches[K, M], M = N*H*W ----
    xp = jnp.pad(x, ((0, 0), (0, 0), (1, 1), (1, 1)))
    patches = jnp.stack(
        [xp[:, :, kh:kh + H, kw:kw + W] for kh in range(3) for kw in range(3)],
        axis=2)                                             # (N, C_in, 9, H, W)
    patches = patches.transpose(1, 2, 0, 3, 4).reshape(C_in * 9, N * H * W)

    K = C_in * 9
    M = N * H * W

    # Pad K to a sublane multiple; pad M to a lane-dense multiple of the tile
    # width so the output tile's last dim is a large multiple of 128.
    K_pad = ((K + 7) // 8) * 8
    tm = max(128, min(tile_m, ((M + 127) // 128) * 128))
    M_pad = ((M + tm - 1) // tm) * tm

    patches = jnp.pad(patches, ((0, K_pad - K), (0, M_pad - M))).astype(f32)
    w2d = jnp.pad(weight.reshape(C_out, K), ((0, 0), (0, K_pad - K))).astype(f32)

    # ---- BatchNorm folded into per-channel scale/shift (running statistics) ----
    # TODO(synk): training-mode BatchNorm (batch statistics over N*H*W + running
    # stat updates) is not implemented; this is inference-mode BN.
    if use_bn:
        gamma_ = jnp.ones((C_out,), f32) if gamma is None else gamma.astype(f32)
        beta_ = jnp.zeros((C_out,), f32) if beta is None else beta.astype(f32)
        mean_ = jnp.zeros((C_out,), f32) if running_mean is None else running_mean.astype(f32)
        var_ = jnp.ones((C_out,), f32) if running_var is None else running_var.astype(f32)
        scale = gamma_ * jax.lax.rsqrt(var_ + eps)
        shift = beta_ - mean_ * scale
    else:
        scale = jnp.ones((C_out,), f32)
        shift = jnp.zeros((C_out,), f32)
    scale = scale.reshape(C_out, 1)
    shift = shift.reshape(C_out, 1)

    grid = (M_pad // tm,)
    out = pl.pallas_call(
        _conv_bn_kernel,
        out_shape=jax.ShapeDtypeStruct((C_out, M_pad), out_dtype),
        grid_spec=pltpu.PrefetchScalarGridSpec(
            num_scalar_prefetch=0,
            grid=grid,
            in_specs=[
                pl.BlockSpec((C_out, K_pad), lambda i: (0, 0)),  # weights (resident)
                pl.BlockSpec((K_pad, tm), lambda i: (0, i)),     # patches (stream M)
                pl.BlockSpec((C_out, 1), lambda i: (0, 0)),      # BN scale
                pl.BlockSpec((C_out, 1), lambda i: (0, 0)),      # BN shift
            ],
            out_specs=pl.BlockSpec((C_out, tm), lambda i: (0, i)),
        ),
        compiler_params=pltpu.CompilerParams(
            dimension_semantics=("parallel",),   # shard M tiles across TCs (v7x)
        ),
    )(w2d, patches, scale, shift)

    # ---- glue: back to NCHW ----
    out = out[:, :M].reshape(C_out, N, H, W).transpose(1, 0, 2, 3)
    return out


if __name__ == "__main__":
    key = jax.random.PRNGKey(0)
    k1, k2, k3, k4 = jax.random.split(key, 4)

    N, C_in, H, W = 2, 3, 16, 16     # stem fixes in_channels = 3
    C_out = 32

    x = jax.random.normal(k1, (N, C_in, H, W), jnp.float32)
    weight = 0.1 * jax.random.normal(k2, (C_out, C_in, 3, 3), jnp.float32)
    gamma = 1.0 + 0.1 * jax.random.normal(k3, (C_out,), jnp.float32)
    beta = 0.1 * jax.random.normal(k4, (C_out,), jnp.float32)
    running_mean = jnp.zeros((C_out,), jnp.float32)
    running_var = jnp.ones((C_out,), jnp.float32)

    out = stem_forward(x, weight, gamma, beta, running_mean, running_var)
    jax.block_until_ready(out)
    assert out.shape == (N, C_out, H, W)

    # Pure-JAX reference: conv + eval-mode BN affine.
    conv_ref = jax.lax.conv_general_dilated(
        x, weight, window_strides=(1, 1), padding=((1, 1), (1, 1)),
        dimension_numbers=("NCHW", "OIHW", "NCHW"))
    eps = 1e-5
    s_ref = gamma / jnp.sqrt(running_var + eps)
    b_ref = beta - running_mean * s_ref
    ref = conv_ref * s_ref[None, :, None, None] + b_ref[None, :, None, None]
    assert jnp.allclose(out, ref, atol=2e-4, rtol=2e-4)

    print("KERNEL_OK")
</pallas_src>

<mosaic_0001>
module attributes {stable_mosaic.version = 11 : i64} {
  func.func @_conv_bn_kernel(%arg0: i32, %arg1: memref<32x32xf32, #tpu.memory_space<vmem>>, %arg2: memref<32x256xf32, #tpu.memory_space<vmem>>, %arg3: memref<32x1xf32, #tpu.memory_space<vmem>>, %arg4: memref<32x1xf32, #tpu.memory_space<vmem>>, %arg5: memref<32x256xf32, #tpu.memory_space<vmem>>) attributes {dimension_semantics = [#tpu.dimension_semantics<parallel>], iteration_bounds = array<i64: 2>, scalar_prefetch = 0 : i64, scratch_operands = 0 : i64, tpu.core_type = #tpu.core_type<tc>, window_params = [{pipeline_mode = #tpu.pipeline_mode<synchronous>, transform_indices = @transform_0, window_bounds = array<i64: 32, 32>}, {transform_indices = @transform_1, window_bounds = array<i64: 32, 256>}, {pipeline_mode = #tpu.pipeline_mode<synchronous>, transform_indices = @transform_2, window_bounds = array<i64: 32, 1>}, {pipeline_mode = #tpu.pipeline_mode<synchronous>, transform_indices = @transform_3, window_bounds = array<i64: 32, 1>}, {transform_indices = @transform_4, window_bounds = array<i64: 32, 256>}]} {
    %c0 = arith.constant 0 : index
    %c0_0 = arith.constant 0 : index
    %0 = vector.load %arg1[%c0, %c0_0] : memref<32x32xf32, #tpu.memory_space<vmem>>, vector<32x32xf32>
    %c0_1 = arith.constant 0 : index
    %c0_2 = arith.constant 0 : index
    %1 = vector.load %arg2[%c0_1, %c0_2] : memref<32x256xf32, #tpu.memory_space<vmem>>, vector<32x256xf32>
    %cst = arith.constant dense<0.000000e+00> : vector<32x256xf32>
    %2 = tpu.matmul %0, %1, %cst {dimension_numbers = #tpu.dot_dimension_numbers<[1], [0], [0], [1], [0, 0, 1, 1], [], []>} : vector<32x32xf32>, vector<32x256xf32>, vector<32x256xf32> -> vector<32x256xf32>
    %c0_3 = arith.constant 0 : index
    %c0_4 = arith.constant 0 : index
    %3 = vector.load %arg3[%c0_3, %c0_4] : memref<32x1xf32, #tpu.memory_space<vmem>>, vector<32x1xf32>
    %4 = vector.broadcast %3 : vector<32x1xf32> to vector<32x256xf32>
    %5 = arith.mulf %2, %4 : vector<32x256xf32>
    %c0_5 = arith.constant 0 : index
    %c0_6 = arith.constant 0 : index
    %6 = vector.load %arg4[%c0_5, %c0_6] : memref<32x1xf32, #tpu.memory_space<vmem>>, vector<32x1xf32>
    %7 = vector.broadcast %6 : vector<32x1xf32> to vector<32x256xf32>
    %8 = arith.addf %5, %7 : vector<32x256xf32>
    %c0_7 = arith.constant 0 : index
    %c0_8 = arith.constant 0 : index
    %9 = vector.load %arg5[%c0_7, %c0_8] : memref<32x256xf32, #tpu.memory_space<vmem>>, vector<32x256xf32>
    tpu.vector_store %arg5[%c0_7, %c0_8], %8 {strides = array<i32>} : memref<32x256xf32, #tpu.memory_space<vmem>>, vector<32x256xf32>,
    return
  }
  func.func @transform_0(%arg0: i32) -> (i32, i32) {
    %c0_i32 = arith.constant 0 : i32
    %c0_i32_0 = arith.constant 0 : i32
    %c0_i32_1 = arith.constant 0 : i32
    return %c0_i32, %c0_i32_0 : i32, i32
  }
  func.func @transform_1(%arg0: i32) -> (i32, i32) {
    %c0_i32 = arith.constant 0 : i32
    %c0_i32_0 = arith.constant 0 : i32
    return %c0_i32, %arg0 : i32, i32
  }
  func.func @transform_2(%arg0: i32) -> (i32, i32) {
    %c0_i32 = arith.constant 0 : i32
    %c0_i32_0 = arith.constant 0 : i32
    %c0_i32_1 = arith.constant 0 : i32
    return %c0_i32, %c0_i32_0 : i32, i32
  }
  func.func @transform_3(%arg0: i32) -> (i32, i32) {
    %c0_i32 = arith.constant 0 : i32
    %c0_i32_0 = arith.constant 0 : i32
    %c0_i32_1 = arith.constant 0 : i32
    return %c0_i32, %c0_i32_0 : i32, i32
  }
  func.func @transform_4(%arg0: i32) -> (i32, i32) {
    %c0_i32 = arith.constant 0 : i32
    %c0_i32_0 = arith.constant 0 : i32
    return %c0_i32, %arg0 : i32, i32
  }
}

</mosaic_0001>

<bundles_post_ra>
// kernel: tpu_custom_call.1
= control target key start
LH: loop header
LB: loop body
LE: loop exit
PB: predicated region body
PF: predicated region fallthrough
CT: control target
= control target key end

     0   :  { %9 = vsyncpa [#allocation3], 0  ;;  %s916_s0 = inlined_call_operand.vmem [shape: f32[32,32], index: 0, kind: input, shape index: {}]   ;;  %s917_s1 = inlined_call_operand.hbm [shape: f32[32,512], index: 1, kind: input, shape index: {}]   ;;  %s918_s2 = inlined_call_operand.vmem [shape: f32[32,1], index: 2, kind: input, shape index: {}]   ;;  %s919_s3 = inlined_call_operand.vmem [shape: f32[32,1], index: 3, kind: input, shape index: {}]   ;;  %s920_s4 = inlined_call_operand.hbm [shape: f32[32,512], index: 4, kind: output, shape index: {}]  }
   0x1   :  { %11 = vsyncpa [#allocation3 + $0x1], 0 }
   0x2   :  { %12 = vsyncpa [#allocation4], 0 }
   0x3   :  { %14 = vsyncpa [#allocation4 + $0x1], 0  ;;  %s712_s15 = smov 0   ;;  %s714_s16 = smov 0  }
   0x4   :  { %s716_s17 = smov 0   ;;  %s718_s18 = smov 0  }
   0x5 LB: > { %s733_s19 = sadd.s32 4294967295, %s675_s18   ;;  %s491_s20 = sadd.s32 4294967294, %s675_s18   ;;  %s675_s18 = sphi %s718_s18, %s934_s18   ;;  %s671_s17 = sphi %s716_s17, %s933_s17   ;;  %s667_s16 = sphi %s714_s16, %s932_s16   ;;  %s663_s15 = sphi %s712_s15, %s931_s15  }
   0x6   : > { %s737_s21 = sadd.s32 1, %s675_s18   ;;  %s48_s22 = sadd.s32 1, %s671_s17 }
   0x7   : > { %s45_s23 = ssub.s32 %s675_s18, %s737_s21  ;;  %p55_p0 = scmp.ne.s32.totalorder %s671_s17, %s667_s16 }
   0x8   : > { %p46_p1 = scmp.eq.s32.totalorder %s45_s23, 0  ;;  %p56_p2 = scmp.eq.s32.totalorder %s675_s18, 0 }
   0x9   : > { %p61_p3 = scmp.ne.s32.totalorder %s667_s16, %s663_s15  ;;  %p62_p4 = scmp.eq.s32.totalorder %s733_s19, 0 }
   0xa   : > { %s749_s24 = scalar_select %p46_p1, %s671_s17, %s48_s22  }
   0xb   : > { %p751_p5 = por %p56_p2, %p55_p0  ;;  %p755_p6 = por %p62_p4, %p61_p3 }
   0xc   : > { %p127_p7 = scmp.eq.s32.totalorder %s733_s19, 1  ;;  %p133_p8 = scmp.eq.s32.totalorder %s491_s20, 1 }
   0xd   : > { %p535_p10 = scmp.lt.s32.totalorder %s675_s18, 2  ;;  %s162_s29 = sand.u32 1, %s671_s17  }
   0xe   : > { %p762_p11 = por %p127_p7, %p55_p0  ;;  %p766_p12 = por %p133_p8, %p61_p3 }
   0xf   : > { %s509_s30 = sshll.u32 %s675_s18, 8  ;;  %s494_s5 = sshll.u32 %s162_s29, 6 }
  0x10   : > { %s924_s27 = scalar_select %p762_p11, 1, 0 }
  0x11   : > { %s925_s28 = scalar_select %p766_p12, 1, 0 }
  0x12   : > { %s775_s8 = scalar_lea.hbm %s917_s1, %s509_s30  ;;  %s166_s9 = scalar_lea.vmem [#allocation2], %s494_s5 }
  0x13   : > { %s173_s10 = sshll.u32 %s166_s9, 4  ;;  %p779_p13 = pnand %p535_p10, %p751_p5  ;;  %s783_s10 = int_to_ptr.vmem [resolvable:$true] %s173_s10 }
  0x14   : > { %s786_s12 = scalar_lea.sflag [#allocation3], %s162_s29  ;;  %s579_s13 = scalar_lea.hbm %s775_s8, 1024 }
  0x15   : > { %p580_p1 = scmp.ne.s32.totalorder %s775_s8, %s579_s13  ;;  %p581_p2 = pneg %p779_p13 }
  0x16   : > { %s584_s22 = scalar_lea.hbm %s917_s1, 2048  ;;  %p585_p5 = scmp.lt.u32.totalorder %s775_s8, %s917_s1 }
  0x17   : > { %p582_p3 = pnand %p581_p2, %p580_p1  ;;  %p586_p7 = scmp.lt.u32.totalorder %s584_s22, %s579_s13 }
  0x18   : > { %p588_p10 = scmp.lt.u32.totalorder %s579_s13, %s775_s8 }
  0x19   : > { %p583_p4 = pneg %p582_p3  ;;  %p587_p8 = por %p586_p7, %p585_p5 }
  0x1b   : > { %p589_p9 = por %p588_p10, %p587_p8 }
  0x1d   : > { %p590_p0 = pnand %p589_p9, %p583_p4 }
  0x1f   : > { %593 = shalt.err (!%p590_p0)
}
  0x20   : > { %s594_s29 = scalar_lea.vmem %s783_s10, 1024  ;;  %s677_s30 = smov [#allocation2]  }
  0x21   : > { %p595_p1 = scmp.ne.s32.totalorder %s783_s10, %s594_s29  ;;  %s599_s5 = sshll.u32 %s677_s30, 4  ;;  %s600_s5 = int_to_ptr.vmem [resolvable:$false] %s599_s5 }
  0x22   : > { %s601_s6 = scalar_lea.vmem %s600_s5, 2048  ;;  %p602_p11 = scmp.lt.s32.totalorder %s783_s10, %s600_s5 }
  0x23   : > { %p597_p3 = pnand %p595_p1, %p581_p2  ;;  %p603_p5 = scmp.lt.s32.totalorder %s601_s6, %s594_s29 }
  0x25   : > { %p598_p12 = pneg %p597_p3  ;;  %p604_p7 = por %p603_p5, %p602_p11 }
  0x27   : > { %p605_p8 = pnand %p604_p7, %p598_p12 }
  0x29   : > { %608 = shalt.err (!%p605_p8)
}
  0x2a   : > { %s678_s7 = smov 512   ;;  %s679_s9 = smov 256  }
  0x2b   : > { %s680_s13 = smov 16   ;;  %p181_p9 = scmp.lt.s32.totalorder %s675_s18, 3 }
  0x2c   : > { %530 = dma.hbm_to_vmem [thread:$0]  (!%p779_p13), %s775_s8, 1024, %s783_s10, %s786_s12, %s678_s7, %s679_s9, %s680_s13  }
  0x2d   : > { %p927_p0 = scmp.ge.s32.totalorder %s675_s18, 1 }
  0x2f   : > { %p182_p2 = pnand %p927_p0, %p181_p9 }
  0x30   : > { %s818_s14 = sand.u32 (!%p182_p2), 1, %s667_s16  }
  0x31   : > { %185 = sbr.rel (%p182_p2) target bundleno = 305 (0x131), region = 36  ;;  %s498_s20 = sshll.u32 (!%p182_p2), %s818_s14, 6 }
  0x32   : > { %s188_s22 = scalar_lea.sflag (!%p182_p2), [#allocation3], %s818_s14  ;;  %s191_s23 = scalar_lea.vmem (!%p182_p2), [#allocation2], %s498_s20 }
  0x38   : > { %654 = dma.done.wait (%p755_p6), %s188_s22, 1024  }
  0x39   : > { %656 = vsyncadd (%p755_p6), %s188_s22, 4294966272  ;;  %v681_v0 = vmov 0.0   ;;  %v682_v1 = vmov 0   ;;  %v223_v2 = vld [vmem:[%s191_s23 + $0x8] sm:$0xff]  ;;  %v225_v3 = vld [vmem:[%s191_s23 + $0x18] sm:$0xff]  ;;  %vm230_vm0 = vcmask 261120  }
  0x3a   : > { %307 = vmatprep.mubr.f32.mxu0 %v681_v0  ;;  %319 = vmatprep.mubr.f32.mxu1 %v681_v0  ;;  %v222_v4 = vld [vmem:[%s191_s23] sm:$0xff]  ;;  %v511_v5 = vpack.c.bf16 %v225_v3, %v223_v2  ;;  %v224_v6 = vld [vmem:[%s191_s23 + $0x10] sm:$0xff]  ;;  %v227_v7 = vld [vmem:[%s191_s23 + $0x28] sm:$0xff]  ;;  %s215_s6 = scalar_lea.vmem [#allocation5], %s498_s20  ;;  %s510_s9 = sshll.u32 %s733_s19, 8 }
  0x3b   : > { %578 = vset.pattern.permute.xlu1 %v682_v1  ;;  %577 = vset.pattern.permute.xlu0 %v682_v1  ;;  %v229_v8 = vld [vmem:[%s191_s23 + $0x38] sm:$0xff]  ;;  %v513_v9 = vpack.c.bf16 %v224_v6, %v222_v4  ;;  %v226_v11 = vld [vmem:[%s191_s23 + $0x20] sm:$0xff]  ;;  %v228_v12 = vld [vmem:[%s191_s23 + $0x30] sm:$0xff]  ;;  %s418_s7 = sshll.u32 %s215_s6, 4  ;;  %s872_s13 = scalar_lea.hbm %s920_s4, %s510_s9  ;;  %s867_s7 = int_to_ptr.vmem [resolvable:$true] %s418_s7 }
  0x3c   : > { %v515_v10 = vpack.c.bf16 %v229_v8, %v227_v7  ;;  %512 = vmatprep.subr.bf16.mxu0 %v511_v5  ;;  %519 = vmatprep.subr.bf16.mxu1 %v511_v5  ;;  %v517_v13 = vpack.c.bf16 %v228_v12, %v226_v11  ;;  %v334_v14 = vld [vmem:[%s918_s2 + $0x10] sm:$0xff]  ;;  %v332_v15 = vld [vmem:[%s918_s2] sm:$0xff]  ;;  %v335_v16 = vld [vmem:[%s918_s2 + $0x18] sm:$0xff]  ;;  %s405_s22 = scalar_lea.sflag [#allocation4], %s818_s14  ;;  %s609_s23 = scalar_lea.vmem %s867_s7, 1024 }
  0x3d   : > { %514 = vmatpush1.bf16.msra.mxu0 %v513_v9  ;;  %521 = vmatpush1.bf16.msra.mxu1 %v513_v9  ;;  %v333_v17 = vld [vmem:[%s918_s2 + $0x8] sm:$0xff]  ;;  %v218_v18 = vld [vmem:[%s916_s0] sm:$0xff]  ;;  %v220_v19 = vld [vmem:[%s916_s0 + $0x10] sm:$0xff]  ;;  %p610_p6 = scmp.ne.s32.totalorder %s867_s7, %s609_s23  ;;  %p928_p11 = scmp.ne.s32.totalorder %s924_s27, 0 }
  0x3e   : > { %516 = vmatprep.subr.bf16.mxu0 %v515_v10  ;;  %520 = vmatprep.subr.bf16.mxu1 %v515_v10  ;;  %v365_v20 = vld [vmem:[%s919_s3 + $0x8] sm:$0xff]  ;;  %v364_v21 = vld [vmem:[%s919_s3] sm:$0xff]  ;;  %v221_v23 = vld [vmem:[%s916_s0 + $0x18] sm:$0xff]  ;;  %s683_s26 = smov [#allocation5]  }
  0x3f   : > { %348 = vperm.xlu1 %578, %v334_v14   ;;  %338 = vperm.xlu0 %577, %v332_v15   ;;  %v219_v22 = vld [vmem:[%s916_s0 + $0x8] sm:$0xff]  ;;  %v367_v24 = vld [vmem:[%s919_s3 + $0x18] sm:$0xff]  ;;  %v366_v25 = vld [vmem:[%s919_s3 + $0x10] sm:$0xff]  ;;  %p611_p12 = pnand %p610_p6, %p928_p11  ;;  %s613_s8 = sshll.u32 %s683_s26, 4  ;;  %s614_s8 = int_to_ptr.vmem [resolvable:$false] %s613_s8 }
  0x40   : > { %s615_s10 = scalar_lea.vmem %s614_s8, 2048  ;;  %p616_p4 = scmp.lt.s32.totalorder %s867_s7, %s614_s8 }
  0x41   : > { %518 = vmatpush1.bf16.msra.mxu0 %v517_v13  ;;  %522 = vmatpush1.bf16.msra.mxu1 %v517_v13  ;;  %p612_p13 = pneg %p611_p12  ;;  %p617_p10 = scmp.lt.s32.totalorder %s615_s10, %s609_s23 }
  0x43   : > { %353 = vperm.xlu1 %578, %v335_v16   ;;  %343 = vperm.xlu0 %577, %v333_v17   ;;  %p618_p1 = por %p617_p10, %p616_p4 }
  0x44   : > { %500 = vmatmul.mubr.msk.f32.vlgmr.msra.gmra.mrb[0].mxu0 %vm230_vm0, %v218_v18  ;;  %502 = vmatmul.mubr.msk.f32.vlgmr.msra.gmra.mrb[0].mxu1 %vm230_vm0, %v220_v19 }
  0x45   : > { %313 = vmatprep.mubr.f32.mxu0 %v681_v0  ;;  %325 = vmatprep.mubr.f32.mxu1 %v681_v0  ;;  %p619_p3 = pnand %p618_p1, %p612_p13 }
  0x47   : > { %375 = vperm.xlu1 %578, %v365_v20   ;;  %370 = vperm.xlu0 %577, %v364_v21  }
  0x48   : > { %501 = vmatmul.mubr.msk.f32.gmra.mrb[2].mxu0 %vm230_vm0, %v219_v22  ;;  %503 = vmatmul.mubr.msk.f32.gmra.mrb[2].mxu1 %vm230_vm0, %v221_v23 }
  0x4b   : > { %385 = vperm.xlu1 %578, %v367_v24   ;;  %380 = vperm.xlu0 %577, %v366_v25  }
  0xbe   : > { %v339_v26 = vpop.permute.xlu0 %338  ;;  %v349_v27 = vpop.permute.xlu1 %348 }
  0xc2   : > { %v344_v28 = vpop.permute.xlu0 %343  ;;  %v354_v29 = vpop.permute.xlu1 %353 }
  0xc6   : > { %v371_v30 = vpop.permute.xlu0 %370  ;;  %v376_v31 = vpop.permute.xlu1 %375 }
  0xca   : > { %v381_v38 = vpop.permute.xlu0 %380  ;;  %v386_v51 = vpop.permute.xlu1 %385 }
 0x117   : > { %v309_v32 = vpop.f32.mrb[0].mxu0  ;;  %v321_v33 = vpop.f32.mrb[0].mxu1 }
 0x118   : > { %v356_v34 = vmul.f32 %v339_v26, %v309_v32  ;;  %v360_v35 = vmul.f32 %v349_v27, %v321_v33  ;;  %v311_v36 = vpop.f32.mrb[1].mxu0  ;;  %v323_v37 = vpop.f32.mrb[1].mxu1 }
 0x119   : > { %v357_v39 = vmul.f32 %v339_v26, %v311_v36  ;;  %v361_v40 = vmul.f32 %v349_v27, %v323_v37 }
 0x11a   : > { %v388_v41 = vadd.f32 %v371_v30, %v356_v34  ;;  %v392_v42 = vadd.f32 %v381_v38, %v360_v35 }
 0x11b   : > { %v389_v43 = vadd.f32 %v371_v30, %v357_v39  ;;  %v393_v44 = vadd.f32 %v381_v38, %v361_v40  ;;  %v315_v45 = vpop.f32.mrb[2].mxu0  ;;  %v327_v46 = vpop.f32.mrb[2].mxu1 }
 0x11c   : > { %396 = vst [vmem:[%s215_s6] sm:$0xff] %v388_v41  ;;  %400 = vst [vmem:[%s215_s6 + $0x20] sm:$0xff] %v392_v42  ;;  %v358_v47 = vmul.f32 %v344_v28, %v315_v45  ;;  %v362_v48 = vmul.f32 %v354_v29, %v327_v46  ;;  %v317_v49 = vpop.f32.mrb[3].mxu0  ;;  %v329_v50 = vpop.f32.mrb[3].mxu1 }
 0x11d   : > { %397 = vst [vmem:[%s215_s6 + $0x8] sm:$0xff] %v389_v43  ;;  %401 = vst [vmem:[%s215_s6 + $0x28] sm:$0xff] %v393_v44  ;;  %v359_v52 = vmul.f32 %v344_v28, %v317_v49  ;;  %v363_v53 = vmul.f32 %v354_v29, %v329_v50 }
 0x11e   : > { %v390_v54 = vadd.f32 %v376_v31, %v358_v47  ;;  %v394_v55 = vadd.f32 %v386_v51, %v362_v48 }
 0x11f   : > { %v391_v56 = vadd.f32 %v376_v31, %v359_v52  ;;  %v395_v57 = vadd.f32 %v386_v51, %v363_v53 }
 0x120   : > { %398 = vst [vmem:[%s215_s6 + $0x10] sm:$0xff] %v390_v54  ;;  %402 = vst [vmem:[%s215_s6 + $0x30] sm:$0xff] %v394_v55 }
 0x121   : > { %399 = vst [vmem:[%s215_s6 + $0x18] sm:$0xff] %v391_v56  ;;  %403 = vst [vmem:[%s215_s6 + $0x38] sm:$0xff] %v395_v57 }
 0x122   : > { %622 = shalt.err (!%p619_p3)
}
 0x123   : > { %s623_s11 = scalar_lea.hbm %s872_s13, 1024  ;;  %s627_s29 = scalar_lea.hbm %s920_s4, 2048 }
 0x124   : > { %p624_p5 = scmp.ne.s32.totalorder %s872_s13, %s623_s11  ;;  %p628_p9 = scmp.lt.u32.totalorder %s872_s13, %s920_s4 }
 0x125   : > { %p629_p0 = scmp.lt.u32.totalorder %s627_s29, %s623_s11  ;;  %p631_p6 = scmp.lt.u32.totalorder %s623_s11, %s872_s13 }
 0x126   : > { %p625_p7 = pnand %p624_p5, %p928_p11 }
 0x127   : > { %p630_p2 = por %p629_p0, %p628_p9 }
 0x128   : > { %p626_p8 = pneg %p625_p7 }
 0x129   : > { %p632_p12 = por %p631_p6, %p630_p2 }
 0x12b   : > { %p633_p13 = pnand %p632_p12, %p626_p8 }
 0x12d   : > { %636 = shalt.err (!%p633_p13)
}
 0x12e   : > { %s684_s6 = smov 256   ;;  %s685_s9 = smov 512  }
 0x12f   : > { %s686_s19 = smov 16  }
 0x130   : > { %525 = dma.vmem_to_hbm [thread:$0]  (%p928_p11), %s867_s7, 1024, %s872_s13, %s405_s22, %s684_s6, %s685_s9, %s686_s19  }
 0x131 PF: > { %s433_s20 = sand.u32 1, %s663_s15   ;;  %p929_p4 = scmp.ne.s32.totalorder %s925_s28, 0 }
 0x132   : > { %p930_p10 = scmp.ge.s32.totalorder %s675_s18, 2  ;;  %s434_s23 = scalar_lea.sflag [#allocation4], %s433_s20 }
 0x134   : > { %p532_p1 = pnand %p930_p10, %p929_p4 }
 0x136   : > { %658 = dma.done.wait (!%p532_p1), %s434_s23, 1024  }
 0x137   : > { %660 = vsyncadd (!%p532_p1), %s434_s23, 4294966272  ;;  %p17_p3 = scmp.ge.s32.totalorder %s737_s21, 4   ;;  %s931_s15 = smov %s667_s16 }
 0x138   : > { %s932_s16 = smov %s671_s17  ;;  %s933_s17 = smov %s749_s24 }
 0x139   : > { %s934_s18 = smov %s737_s21  ;;  %19 = sbr.rel (!%p17_p3) target bundleno = 5 (0x5), region = 81 }
 0x140   :  { %439 = vsyncpa [#allocation3], 1 }
 0x141   :  { %441 = vsyncpa [#allocation3 + $0x1], 1 }
 0x142   :  { %442 = vsyncpa [#allocation4], 1 }
 0x143   :  { %444 = vsyncpa [#allocation4 + $0x1], 1 }

</bundles_post_ra>
